<compile_context>
chip_gen: v7x
topology: tpu7x:2x2x1
jax: 0.10.0
libtpu: 0.0.40
codegen_flags: <defaults>
</compile_context>

<pallas_src>
import jax
import jax.numpy as jnp
from jax.experimental import pallas as pl
from jax.experimental.pallas import tpu as pltpu


LANE = 128
SUBLANE = 8


def _round_up(n, m):
    return ((n + m - 1) // m) * m


def _cdiv(a, b):
    return (a + b - 1) // b


def _fused_mlp_kernel(x_ref, w1_ref, b1_ref, w2_ref, b2_ref, out_ref, acc_ref):
    """K-tiled, normalizer-folded MLP: relu(x @ w1 + b1) @ w2 + b2.

    x_ref  : (TB, TK)        f32 activation tile (bf16-cast in-kernel)
    w1_ref : (TK, HID_pad)   bf16
    b1_ref : (1, HID_pad)    f32
    w2_ref : (HID_pad, N_pad) bf16, VMEM-resident (constant index_map)
    b2_ref : (1, N_pad)      f32
    out_ref: (TB, N_pad)     f32, lane-dense
    acc_ref: (TB, HID_pad)   f32 scratch accumulator across the K grid axis
    """
    k = pl.program_id(1)
    partial = jnp.dot(x_ref[...].astype(jnp.bfloat16), w1_ref[...],
                      preferred_element_type=jnp.float32)

    @pl.when(k == 0)
    def _():
        acc_ref[...] = partial

    @pl.when(k > 0)
    def _():
        acc_ref[...] = acc_ref[...] + partial

    @pl.when(k == pl.num_programs(1) - 1)
    def _():
        h = jnp.maximum(acc_ref[...] + b1_ref[...], 0.0)
        y = jnp.dot(h.astype(jnp.bfloat16), w2_ref[...],
                    preferred_element_type=jnp.float32)
        out_ref[...] = y + b2_ref[...]


def _vmem_budget():
    """Physical VMEM capacity and a usable budget with ~8 MiB headroom."""
    try:
        cap = int(pltpu.get_tpu_info().vmem_capacity_bytes)
    except Exception:
        cap = 64 * 1024 * 1024          # v7x floor: safe on every generation
    return cap, cap - 8 * 1024 * 1024


def _working_set_bytes(tb, tk, hid_p, n_p, n_k, single_buffer_weights):
    wbuf = 1 if (single_buffer_weights and n_k == 1) else 2   # w1 buffers
    rbuf = 1 if single_buffer_weights else 2                  # resident w2/biases
    return (2 * tb * tk * 4                      # x tiles   (f32, double-buffered)
            + wbuf * tk * hid_p * 2              # w1 tiles  (bf16)
            + rbuf * (hid_p * n_p * 2            # w2        (bf16)
                      + (hid_p + n_p) * 4)       # biases    (f32)
            + 2 * tb * n_p * 4                   # out tiles (f32, double-buffered)
            + tb * hid_p * 4                     # acc scratch (f32)
            + tb * tk * 2                        # in-kernel bf16 cast of x
            + tb * hid_p * (4 + 2)               # h (f32) + its bf16 cast
            + tb * n_p * 4)                      # y (f32)


def _select_tiles(batch, d_pad, hid_p, n_p, single_buffer_weights):
    # Batch tile: large tiles amortize the ~0.35us/step overhead; halve when the
    # "parallel" grid would have 1 (or an odd number of) steps so both v7x
    # TensorCores get work.
    if batch >= 512:
        tb = 512
    elif batch >= 256:
        tb = 256
    elif batch >= 128:
        tb = 128
    else:
        tb = max(SUBLANE, _round_up(batch, SUBLANE))
    steps = _cdiv(batch, tb)
    if tb >= 16 and (steps == 1 or steps % 2 == 1):
        tb = max(SUBLANE, tb // 2)

    _, budget = _vmem_budget()

    # K tile: largest multiple of 128 dividing d_pad that keeps the working set
    # inside the per-generation budget (only kicks in for large D).
    candidates = [d_pad] + [t for t in (16384, 8192, 4096, 2048, 1024, 512, 256, 128)
                            if t < d_pad and d_pad % t == 0]
    tk = candidates[-1]
    for cand in candidates:
        if _working_set_bytes(tb, cand, hid_p, n_p, d_pad // cand,
                              single_buffer_weights) <= budget:
            tk = cand
            break
    while (_working_set_bytes(tb, tk, hid_p, n_p, d_pad // tk,
                              single_buffer_weights) > budget and tb > SUBLANE):
        tb = max(SUBLANE, tb // 2)

    ws = _working_set_bytes(tb, tk, hid_p, n_p, d_pad // tk, single_buffer_weights)
    # Always set an explicit limit (v5e default scoped VMEM is only 16 MiB),
    # never above physical-capacity-minus-headroom (v7x is 64 MiB).
    vmem_limit = int(min(budget, max(ws + 8 * 1024 * 1024, 32 * 1024 * 1024)))
    return tb, tk, vmem_limit


def make_model_wrapper_forward(mean_c, std_c, w1, b1, w2, b2, input_chw,
                               *, single_buffer_weights=True):
    """Build a jitted ModelWrapper forward; weight prep is done once here."""
    C, H, W = input_chw
    D = C * H * W
    HID = int(w1.shape[0])
    NCLS = int(w2.shape[0])

    # Fold the per-channel normalizer into the first Linear:
    #   relu(((x - mean)/std) @ w1.T + b1) == relu(x @ w1_eff + b1_eff)
    mean_flat = jnp.broadcast_to(mean_c[:, None, None], (C, H, W)).reshape(D)
    inv_std_flat = (1.0 / jnp.broadcast_to(std_c[:, None, None], (C, H, W))).reshape(D)
    w1_t = w1.T.astype(jnp.float32)                    # (D, HID)
    w1_eff = w1_t * inv_std_flat[:, None]
    b1_eff = b1.astype(jnp.float32) - (mean_flat * inv_std_flat) @ w1_t
    w2_t = w2.T.astype(jnp.float32)                    # (HID, NCLS)

    D_pad = _round_up(D, LANE)
    HID_pad = _round_up(HID, LANE)   # keep at 128-multiples; don't pad to 256 for the MXU
    N_pad = _round_up(NCLS, LANE)    # lane-dense output stores

    # Padded bf16/f32 parameters (computed once, captured as constants below).
    w1_p = jnp.zeros((D_pad, HID_pad), jnp.bfloat16).at[:D, :HID].set(
        w1_eff.astype(jnp.bfloat16))
    b1_p = jnp.zeros((1, HID_pad), jnp.float32).at[0, :HID].set(b1_eff)
    w2_p = jnp.zeros((HID_pad, N_pad), jnp.bfloat16).at[:HID, :NCLS].set(
        w2_t.astype(jnp.bfloat16))
    b2_p = jnp.zeros((1, N_pad), jnp.float32).at[0, :NCLS].set(
        b2.astype(jnp.float32))

    @jax.jit
    def forward(x_nchw):
        B = x_nchw.shape[0]
        x_flat = x_nchw.reshape(B, D).astype(jnp.float32)   # torch.flatten(x, 1)
        if D_pad != D:                      # rare: feature dim not lane-aligned
            x_flat = jnp.pad(x_flat, ((0, 0), (0, D_pad - D)))

        TB, TK, vmem_limit = _select_tiles(B, D_pad, HID_pad, N_pad,
                                           single_buffer_weights)
        B_pad = _round_up(B, TB)
        if B_pad != B:                      # cheap: batch-axis-only pad
            x_flat = jnp.pad(x_flat, ((0, B_pad - B), (0, 0)))
        n_k = D_pad // TK

        # Resident operands (constant index_map) don't need double-buffering.
        res_mode = ({"pipeline_mode": pl.Buffered(1)}
                    if single_buffer_weights else {})
        w1_mode = res_mode if n_k == 1 else {}

        out_p = pl.pallas_call(
            _fused_mlp_kernel,
            out_shape=jax.ShapeDtypeStruct((B_pad, N_pad), jnp.float32),
            grid=(B_pad // TB, n_k),
            in_specs=[
                pl.BlockSpec((TB, TK), lambda i, k: (i, k)),               # x
                pl.BlockSpec((TK, HID_pad), lambda i, k: (k, 0), **w1_mode),
                pl.BlockSpec((1, HID_pad), lambda i, k: (0, 0), **res_mode),
                pl.BlockSpec((HID_pad, N_pad), lambda i, k: (0, 0), **res_mode),
                pl.BlockSpec((1, N_pad), lambda i, k: (0, 0), **res_mode),
            ],
            out_specs=pl.BlockSpec((TB, N_pad), lambda i, k: (i, 0)),
            scratch_shapes=[pltpu.VMEM((TB, HID_pad), jnp.float32)],
            compiler_params=pltpu.CompilerParams(
                dimension_semantics=("parallel", "arbitrary"),
                vmem_limit_bytes=vmem_limit),
        )(x_flat, w1_p, b1_p, w2_p, b2_p)

        return out_p[:B, :NCLS]

    return forward


def _reference_forward(x_nchw, mean_c, std_c, w1, b1, w2, b2):
    """Pure-JAX f32 reference mirroring the PyTorch semantics exactly."""
    xn = (x_nchw - mean_c[None, :, None, None]) / std_c[None, :, None, None]
    x_flat = xn.reshape(xn.shape[0], -1)
    h = jnp.maximum(x_flat @ w1.T + b1, 0.0)
    return h @ w2.T + b2


if __name__ == "__main__":
    # Small shapes consistent with the module: batch=2, channels=4, spatial=16.
    B, C, H, W = 2, 4, 16, 16
    D = C * H * W          # 1024
    HID = 128
    NCLS = 10

    key = jax.random.PRNGKey(0)
    kx, kw1, kb1, kw2, kb2, km, ks = jax.random.split(key, 7)

    x = jax.random.normal(kx, (B, C, H, W), dtype=jnp.float32)

    # Deterministic per-channel "normalizer" stats and model parameters.
    mean_c = jax.random.normal(km, (C,), dtype=jnp.float32) * 0.1
    std_c = 0.5 + jax.nn.softplus(jax.random.normal(ks, (C,), dtype=jnp.float32))

    w1 = jax.random.normal(kw1, (HID, D), dtype=jnp.float32) * (1.0 / jnp.sqrt(D))
    b1 = jax.random.normal(kb1, (HID,), dtype=jnp.float32) * 0.01
    w2 = jax.random.normal(kw2, (NCLS, HID), dtype=jnp.float32) * (1.0 / jnp.sqrt(HID))
    b2 = jax.random.normal(kb2, (NCLS,), dtype=jnp.float32) * 0.01

    fwd = make_model_wrapper_forward(mean_c, std_c, w1, b1, w2, b2, (C, H, W))
    try:
        out = jax.block_until_ready(fwd(x))
    except Exception:
        # If this Pallas build rejects single-buffered (Buffered(1)) resident
        # weights, retry with default double-buffering (tiny VMEM cost here).
        fwd = make_model_wrapper_forward(mean_c, std_c, w1, b1, w2, b2, (C, H, W),
                                         single_buffer_weights=False)
        out = jax.block_until_ready(fwd(x))

    ref = _reference_forward(x, mean_c, std_c, w1, b1, w2, b2)
    assert out.shape == (B, NCLS)
    # bf16 weights/activations (f32 MXU accumulation) => relaxed tolerance.
    assert jnp.allclose(out, ref, atol=5e-2, rtol=5e-2), "mismatch vs reference"

    # TODO(synk): register_layers / extract_features rely on PyTorch forward
    # hooks + eval()-based attribute lookup; the intermediate ReLU activation
    # could be exposed as a second kernel output, but the dynamic hook
    # machinery itself has no Pallas equivalent.
    print("KERNEL_OK")
</pallas_src>

<mosaic_0001>
module attributes {stable_mosaic.version = 11 : i64} {
  func.func @_fused_mlp_kernel(%arg0: i32, %arg1: i32, %arg2: memref<8x1024xf32, #tpu.memory_space<vmem>>, %arg3: memref<1024x128xbf16, #tpu.memory_space<vmem>>, %arg4: memref<1x128xf32, #tpu.memory_space<vmem>>, %arg5: memref<128x128xbf16, #tpu.memory_space<vmem>>, %arg6: memref<1x128xf32, #tpu.memory_space<vmem>>, %arg7: memref<8x128xf32, #tpu.memory_space<vmem>>, %arg8: memref<8x128xf32, #tpu.memory_space<vmem>>) attributes {dimension_semantics = [#tpu.dimension_semantics<parallel>, #tpu.dimension_semantics<arbitrary>], iteration_bounds = array<i64: 1, 1>, scalar_prefetch = 0 : i64, scratch_operands = 1 : i64, tpu.core_type = #tpu.core_type<tc>, window_params = [{transform_indices = @transform_0, window_bounds = array<i64: 8, 1024>}, {pipeline_mode = #tpu.pipeline_mode<synchronous>, transform_indices = @transform_1, window_bounds = array<i64: 1024, 128>}, {pipeline_mode = #tpu.pipeline_mode<synchronous>, transform_indices = @transform_2, window_bounds = array<i64: 1, 128>}, {pipeline_mode = #tpu.pipeline_mode<synchronous>, transform_indices = @transform_3, window_bounds = array<i64: 128, 128>}, {pipeline_mode = #tpu.pipeline_mode<synchronous>, transform_indices = @transform_4, window_bounds = array<i64: 1, 128>}, {transform_indices = @transform_5, window_bounds = array<i64: 8, 128>}]} {
    %c0 = arith.constant 0 : index
    %c0_0 = arith.constant 0 : index
    %0 = vector.load %arg2[%c0, %c0_0] : memref<8x1024xf32, #tpu.memory_space<vmem>>, vector<8x1024xf32>
    %1 = arith.truncf %0 : vector<8x1024xf32> to vector<8x1024xbf16>
    %c0_1 = arith.constant 0 : index
    %c0_2 = arith.constant 0 : index
    %2 = vector.load %arg3[%c0_1, %c0_2] : memref<1024x128xbf16, #tpu.memory_space<vmem>>, vector<1024x128xbf16>
    %cst = arith.constant dense<0.000000e+00> : vector<8x128xf32>
    %3 = tpu.matmul %1, %2, %cst {dimension_numbers = #tpu.dot_dimension_numbers<[1], [0], [0], [1], [0, 0, 1, 1], [], []>} : vector<8x1024xbf16>, vector<1024x128xbf16>, vector<8x128xf32> -> vector<8x128xf32>
    %c0_i32 = arith.constant 0 : i32
    %4 = arith.cmpi eq, %arg1, %c0_i32 : i32
    %5 = arith.extui %4 : i1 to i32
    %c0_i32_3 = arith.constant 0 : i32
    %6 = arith.cmpi ne, %5, %c0_i32_3 : i32
    scf.if %6 {
      %c0_8 = arith.constant 0 : index
      %c0_9 = arith.constant 0 : index
      %13 = vector.load %arg8[%c0_8, %c0_9] : memref<8x128xf32, #tpu.memory_space<vmem>>, vector<8x128xf32>
      tpu.vector_store %arg8[%c0_8, %c0_9], %3 {strides = array<i32>} : memref<8x128xf32, #tpu.memory_space<vmem>>, vector<8x128xf32>,
    } else {
    }
    %c0_i32_4 = arith.constant 0 : i32
    %7 = arith.cmpi sgt, %arg1, %c0_i32_4 : i32
    %8 = arith.extui %7 : i1 to i32
    %c0_i32_5 = arith.constant 0 : i32
    %9 = arith.cmpi ne, %8, %c0_i32_5 : i32
    scf.if %9 {
      %c0_8 = arith.constant 0 : index
      %c0_9 = arith.constant 0 : index
      %13 = vector.load %arg8[%c0_8, %c0_9] : memref<8x128xf32, #tpu.memory_space<vmem>>, vector<8x128xf32>
      %14 = arith.addf %13, %3 : vector<8x128xf32>
      %c0_10 = arith.constant 0 : index
      %c0_11 = arith.constant 0 : index
      %15 = vector.load %arg8[%c0_10, %c0_11] : memref<8x128xf32, #tpu.memory_space<vmem>>, vector<8x128xf32>
      tpu.vector_store %arg8[%c0_10, %c0_11], %14 {strides = array<i32>} : memref<8x128xf32, #tpu.memory_space<vmem>>, vector<8x128xf32>,
    } else {
    }
    %c0_i32_6 = arith.constant 0 : i32
    %10 = arith.cmpi eq, %arg1, %c0_i32_6 : i32
    %11 = arith.extui %10 : i1 to i32
    %c0_i32_7 = arith.constant 0 : i32
    %12 = arith.cmpi ne, %11, %c0_i32_7 : i32
    scf.if %12 {
      %c0_8 = arith.constant 0 : index
      %c0_9 = arith.constant 0 : index
      %13 = vector.load %arg8[%c0_8, %c0_9] : memref<8x128xf32, #tpu.memory_space<vmem>>, vector<8x128xf32>
      %c0_10 = arith.constant 0 : index
      %c0_11 = arith.constant 0 : index
      %14 = vector.load %arg4[%c0_10, %c0_11] : memref<1x128xf32, #tpu.memory_space<vmem>>, vector<1x128xf32>
      %15 = vector.broadcast %14 : vector<1x128xf32> to vector<8x128xf32>
      %16 = arith.addf %13, %15 : vector<8x128xf32>
      %cst_12 = arith.constant 0.000000e+00 : f32
      %17 = vector.broadcast %cst_12 : f32 to vector<8x128xf32>
      %18 = arith.maximumf %16, %17 : vector<8x128xf32>
      %19 = arith.truncf %18 : vector<8x128xf32> to vector<8x128xbf16>
      %c0_13 = arith.constant 0 : index
      %c0_14 = arith.constant 0 : index
      %20 = vector.load %arg5[%c0_13, %c0_14] : memref<128x128xbf16, #tpu.memory_space<vmem>>, vector<128x128xbf16>
      %cst_15 = arith.constant dense<0.000000e+00> : vector<8x128xf32>
      %21 = tpu.matmul %19, %20, %cst_15 {dimension_numbers = #tpu.dot_dimension_numbers<[1], [0], [0], [1], [0, 0, 1, 1], [], []>} : vector<8x128xbf16>, vector<128x128xbf16>, vector<8x128xf32> -> vector<8x128xf32>
      %c0_16 = arith.constant 0 : index
      %c0_17 = arith.constant 0 : index
      %22 = vector.load %arg6[%c0_16, %c0_17] : memref<1x128xf32, #tpu.memory_space<vmem>>, vector<1x128xf32>
      %23 = vector.broadcast %22 : vector<1x128xf32> to vector<8x128xf32>
      %24 = arith.addf %21, %23 : vector<8x128xf32>
      %c0_18 = arith.constant 0 : index
      %c0_19 = arith.constant 0 : index
      %25 = vector.load %arg7[%c0_18, %c0_19] : memref<8x128xf32, #tpu.memory_space<vmem>>, vector<8x128xf32>
      tpu.vector_store %arg7[%c0_18, %c0_19], %24 {strides = array<i32>} : memref<8x128xf32, #tpu.memory_space<vmem>>, vector<8x128xf32>,
    } else {
    }
    return
  }
  func.func @transform_0(%arg0: i32, %arg1: i32) -> (i32, i32) {
    %c0_i32 = arith.constant 0 : i32
    return %arg0, %arg1 : i32, i32
  }
  func.func @transform_1(%arg0: i32, %arg1: i32) -> (i32, i32) {
    %c0_i32 = arith.constant 0 : i32
    %c0_i32_0 = arith.constant 0 : i32
    return %arg1, %c0_i32 : i32, i32
  }
  func.func @transform_2(%arg0: i32, %arg1: i32) -> (i32, i32) {
    %c0_i32 = arith.constant 0 : i32
    %c0_i32_0 = arith.constant 0 : i32
    %c0_i32_1 = arith.constant 0 : i32
    return %c0_i32, %c0_i32_0 : i32, i32
  }
  func.func @transform_3(%arg0: i32, %arg1: i32) -> (i32, i32) {
    %c0_i32 = arith.constant 0 : i32
    %c0_i32_0 = arith.constant 0 : i32
    %c0_i32_1 = arith.constant 0 : i32
    return %c0_i32, %c0_i32_0 : i32, i32
  }
  func.func @transform_4(%arg0: i32, %arg1: i32) -> (i32, i32) {
    %c0_i32 = arith.constant 0 : i32
    %c0_i32_0 = arith.constant 0 : i32
    %c0_i32_1 = arith.constant 0 : i32
    return %c0_i32, %c0_i32_0 : i32, i32
  }
  func.func @transform_5(%arg0: i32, %arg1: i32) -> (i32, i32) {
    %c0_i32 = arith.constant 0 : i32
    %c0_i32_0 = arith.constant 0 : i32
    return %arg0, %c0_i32 : i32, i32
  }
}

module attributes {stable_mosaic.version = 11 : i64} {
  func.func @_fused_mlp_kernel(%arg0: i32, %arg1: i32, %arg2: memref<8x1024xf32, #tpu.memory_space<vmem>>, %arg3: memref<1024x128xbf16, #tpu.memory_space<vmem>>, %arg4: memref<1x128xf32, #tpu.memory_space<vmem>>, %arg5: memref<128x128xbf16, #tpu.memory_space<vmem>>, %arg6: memref<1x128xf32, #tpu.memory_space<vmem>>, %arg7: memref<8x128xf32, #tpu.memory_space<vmem>>, %arg8: memref<8x128xf32, #tpu.memory_space<vmem>>) attributes {dimension_semantics = [#tpu.dimension_semantics<parallel>, #tpu.dimension_semantics<arbitrary>], iteration_bounds = array<i64: 1, 1>, scalar_prefetch = 0 : i64, scratch_operands = 1 : i64, tpu.core_type = #tpu.core_type<tc>, window_params = [{transform_indices = @transform_0, window_bounds = array<i64: 8, 1024>}, {transform_indices = @transform_1, window_bounds = array<i64: 1024, 128>}, {pipeline_mode = #tpu.pipeline_mode<synchronous>, transform_indices = @transform_2, window_bounds = array<i64: 1, 128>}, {pipeline_mode = #tpu.pipeline_mode<synchronous>, transform_indices = @transform_3, window_bounds = array<i64: 128, 128>}, {pipeline_mode = #tpu.pipeline_mode<synchronous>, transform_indices = @transform_4, window_bounds = array<i64: 1, 128>}, {transform_indices = @transform_5, window_bounds = array<i64: 8, 128>}]} {
    %c0 = arith.constant 0 : index
    %c0_0 = arith.constant 0 : index
    %0 = vector.load %arg2[%c0, %c0_0] : memref<8x1024xf32, #tpu.memory_space<vmem>>, vector<8x1024xf32>
    %1 = arith.truncf %0 : vector<8x1024xf32> to vector<8x1024xbf16>
    %c0_1 = arith.constant 0 : index
    %c0_2 = arith.constant 0 : index
    %2 = vector.load %arg3[%c0_1, %c0_2] : memref<1024x128xbf16, #tpu.memory_space<vmem>>, vector<1024x128xbf16>
    %cst = arith.constant dense<0.000000e+00> : vector<8x128xf32>
    %3 = tpu.matmul %1, %2, %cst {dimension_numbers = #tpu.dot_dimension_numbers<[1], [0], [0], [1], [0, 0, 1, 1], [], []>} : vector<8x1024xbf16>, vector<1024x128xbf16>, vector<8x128xf32> -> vector<8x128xf32>
    %c0_i32 = arith.constant 0 : i32
    %4 = arith.cmpi eq, %arg1, %c0_i32 : i32
    %5 = arith.extui %4 : i1 to i32
    %c0_i32_3 = arith.constant 0 : i32
    %6 = arith.cmpi ne, %5, %c0_i32_3 : i32
    scf.if %6 {
      %c0_8 = arith.constant 0 : index
      %c0_9 = arith.constant 0 : index
      %13 = vector.load %arg8[%c0_8, %c0_9] : memref<8x128xf32, #tpu.memory_space<vmem>>, vector<8x128xf32>
      tpu.vector_store %arg8[%c0_8, %c0_9], %3 {strides = array<i32>} : memref<8x128xf32, #tpu.memory_space<vmem>>, vector<8x128xf32>,
    } else {
    }
    %c0_i32_4 = arith.constant 0 : i32
    %7 = arith.cmpi sgt, %arg1, %c0_i32_4 : i32
    %8 = arith.extui %7 : i1 to i32
    %c0_i32_5 = arith.constant 0 : i32
    %9 = arith.cmpi ne, %8, %c0_i32_5 : i32
    scf.if %9 {
      %c0_8 = arith.constant 0 : index
      %c0_9 = arith.constant 0 : index
      %13 = vector.load %arg8[%c0_8, %c0_9] : memref<8x128xf32, #tpu.memory_space<vmem>>, vector<8x128xf32>
      %14 = arith.addf %13, %3 : vector<8x128xf32>
      %c0_10 = arith.constant 0 : index
      %c0_11 = arith.constant 0 : index
      %15 = vector.load %arg8[%c0_10, %c0_11] : memref<8x128xf32, #tpu.memory_space<vmem>>, vector<8x128xf32>
      tpu.vector_store %arg8[%c0_10, %c0_11], %14 {strides = array<i32>} : memref<8x128xf32, #tpu.memory_space<vmem>>, vector<8x128xf32>,
    } else {
    }
    %c0_i32_6 = arith.constant 0 : i32
    %10 = arith.cmpi eq, %arg1, %c0_i32_6 : i32
    %11 = arith.extui %10 : i1 to i32
    %c0_i32_7 = arith.constant 0 : i32
    %12 = arith.cmpi ne, %11, %c0_i32_7 : i32
    scf.if %12 {
      %c0_8 = arith.constant 0 : index
      %c0_9 = arith.constant 0 : index
      %13 = vector.load %arg8[%c0_8, %c0_9] : memref<8x128xf32, #tpu.memory_space<vmem>>, vector<8x128xf32>
      %c0_10 = arith.constant 0 : index
      %c0_11 = arith.constant 0 : index
      %14 = vector.load %arg4[%c0_10, %c0_11] : memref<1x128xf32, #tpu.memory_space<vmem>>, vector<1x128xf32>
      %15 = vector.broadcast %14 : vector<1x128xf32> to vector<8x128xf32>
      %16 = arith.addf %13, %15 : vector<8x128xf32>
      %cst_12 = arith.constant 0.000000e+00 : f32
      %17 = vector.broadcast %cst_12 : f32 to vector<8x128xf32>
      %18 = arith.maximumf %16, %17 : vector<8x128xf32>
      %19 = arith.truncf %18 : vector<8x128xf32> to vector<8x128xbf16>
      %c0_13 = arith.constant 0 : index
      %c0_14 = arith.constant 0 : index
      %20 = vector.load %arg5[%c0_13, %c0_14] : memref<128x128xbf16, #tpu.memory_space<vmem>>, vector<128x128xbf16>
      %cst_15 = arith.constant dense<0.000000e+00> : vector<8x128xf32>
      %21 = tpu.matmul %19, %20, %cst_15 {dimension_numbers = #tpu.dot_dimension_numbers<[1], [0], [0], [1], [0, 0, 1, 1], [], []>} : vector<8x128xbf16>, vector<128x128xbf16>, vector<8x128xf32> -> vector<8x128xf32>
      %c0_16 = arith.constant 0 : index
      %c0_17 = arith.constant 0 : index
      %22 = vector.load %arg6[%c0_16, %c0_17] : memref<1x128xf32, #tpu.memory_space<vmem>>, vector<1x128xf32>
      %23 = vector.broadcast %22 : vector<1x128xf32> to vector<8x128xf32>
      %24 = arith.addf %21, %23 : vector<8x128xf32>
      %c0_18 = arith.constant 0 : index
      %c0_19 = arith.constant 0 : index
      %25 = vector.load %arg7[%c0_18, %c0_19] : memref<8x128xf32, #tpu.memory_space<vmem>>, vector<8x128xf32>
      tpu.vector_store %arg7[%c0_18, %c0_19], %24 {strides = array<i32>} : memref<8x128xf32, #tpu.memory_space<vmem>>, vector<8x128xf32>,
    } else {
    }
    return
  }
  func.func @transform_0(%arg0: i32, %arg1: i32) -> (i32, i32) {
    %c0_i32 = arith.constant 0 : i32
    return %arg0, %arg1 : i32, i32
  }
  func.func @transform_1(%arg0: i32, %arg1: i32) -> (i32, i32) {
    %c0_i32 = arith.constant 0 : i32
    %c0_i32_0 = arith.constant 0 : i32
    return %arg1, %c0_i32 : i32, i32
  }
  func.func @transform_2(%arg0: i32, %arg1: i32) -> (i32, i32) {
    %c0_i32 = arith.constant 0 : i32
    %c0_i32_0 = arith.constant 0 : i32
    %c0_i32_1 = arith.constant 0 : i32
    return %c0_i32, %c0_i32_0 : i32, i32
  }
  func.func @transform_3(%arg0: i32, %arg1: i32) -> (i32, i32) {
    %c0_i32 = arith.constant 0 : i32
    %c0_i32_0 = arith.constant 0 : i32
    %c0_i32_1 = arith.constant 0 : i32
    return %c0_i32, %c0_i32_0 : i32, i32
  }
  func.func @transform_4(%arg0: i32, %arg1: i32) -> (i32, i32) {
    %c0_i32 = arith.constant 0 : i32
    %c0_i32_0 = arith.constant 0 : i32
    %c0_i32_1 = arith.constant 0 : i32
    return %c0_i32, %c0_i32_0 : i32, i32
  }
  func.func @transform_5(%arg0: i32, %arg1: i32) -> (i32, i32) {
    %c0_i32 = arith.constant 0 : i32
    %c0_i32_0 = arith.constant 0 : i32
    return %arg0, %c0_i32 : i32, i32
  }
}

</mosaic_0001>

<bundles_post_ra>
// kernel: forward.1
= control target key start
LH: loop header
LB: loop body
LE: loop exit
PB: predicated region body
PF: predicated region fallthrough
CT: control target
= control target key end

     0   :  { %10 = vsyncpa [#allocation4], 0  ;;  %s1158_s18 = smov [#allocation3]   ;;  %s1262_s0 = inlined_call_operand.vmem [shape: f32[8,1024], index: 0, kind: input, shape index: {}]   ;;  %s1263_s1 = inlined_call_operand.hbm [shape: bf16[1024,128], index: 1, kind: input, shape index: {}]   ;;  %s1264_s2 = inlined_call_operand.vmem [shape: f32[1,128], index: 2, kind: input, shape index: {}]   ;;  %s1265_s3 = inlined_call_operand.vmem [shape: bf16[128,128], index: 3, kind: input, shape index: {}]   ;;  %s1266_s4 = inlined_call_operand.vmem [shape: f32[1,128], index: 4, kind: input, shape index: {}]   ;;  %s1267_s5 = inlined_call_operand.vmem [shape: f32[8,128], index: 5, kind: output, shape index: {}]  }
   0x1   :  { %s18_s19 = sshll.u32 %s1158_s18, 4  ;;  %s1134_s22 = scalar_lea.hbm %s1263_s1, 8192  ;;  %s19_s19 = int_to_ptr.vmem [resolvable:$true] %s18_s19 }
   0x2   :  { %p1135_p0 = scmp.ne.s32.totalorder %s1263_s1, %s1134_s22  ;;  %p1138_p1 = scmp.lt.u32.totalorder %s1134_s22, %s1263_s1 }
   0x4   :  { %p1140_p2 = pnand %p1138_p1, %p1135_p0 }
   0x6   :  { %1143 = shalt.err (!%p1140_p2)
}
   0x7   :  { %s1144_s27 = scalar_lea.vmem %s19_s19, 8192  ;;  %p1149_p4 = scmp.lt.s32.totalorder %s19_s19, %s19_s19 }
   0x8   :  { %p1145_p3 = scmp.ne.s32.totalorder %s19_s19, %s1144_s27  ;;  %p1150_p5 = scmp.lt.s32.totalorder %s1144_s27, %s1144_s27 }
   0xa   :  { %p1151_p6 = por %p1150_p5, %p1149_p4 }
   0xc   :  { %p1152_p7 = pnand %p1151_p6, %p1145_p3 }
   0xe   :  { %1155 = shalt.err (!%p1152_p7)
}
   0xf   :  { %s1159_s28 = smov 64   ;;  %s1160_s29 = smov 4  }
  0x10   :  { %24 = dma.hbm_to_vmem [thread:$0]  %s1263_s1, 8192, %s19_s19, [#allocation4], %s1159_s28, %s1159_s28, %s1160_s29  }
  0x11   :  { %1156 = dma.done.wait [#allocation4], 8192  }
  0x12   :  { %1157 = vsyncadd [#allocation4], 4294959104  ;;  %v1062_v0 = vld [vmem:[#allocation3 + $0x40] sm:$0xff]   ;;  %v1066_v4 = vld [vmem:[#allocation3 + $0x48] sm:$0xff]   ;;  %vm1162_vm0 = vmmov 0  }
  0x13   :  { %v1063_v1 = vld [vmem:[#allocation3 + $0xc0] sm:$0xff]   ;;  %940 = vmatprep.subr.bf16.mxu0 %v1062_v0  ;;  %v1067_v5 = vld [vmem:[#allocation3 + $0xc8] sm:$0xff]   ;;  %v1070_v8 = vld [vmem:[#allocation3 + $0x50] sm:$0xff]  }
  0x14   :  { %v1064_v2 = vld [vmem:[#allocation3] sm:$0xff]   ;;  %962 = vmatprep.subr.bf16.mxu1 %v1063_v1  ;;  %v1068_v6 = vld [vmem:[#allocation3 + $0x8] sm:$0xff]   ;;  %v1071_v9 = vld [vmem:[#allocation3 + $0xd0] sm:$0xff]  }
  0x15   :  { %v1065_v3 = vld [vmem:[#allocation3 + $0x80] sm:$0xff]   ;;  %941 = vmatpush3.bf16.msra.mxu0 %v1064_v2  ;;  %v1069_v7 = vld [vmem:[#allocation3 + $0x88] sm:$0xff]   ;;  %v1072_v10 = vld [vmem:[#allocation3 + $0x10] sm:$0xff]  }
  0x16   :  { %963 = vmatpush3.bf16.msra.mxu1 %v1065_v3  ;;  %942 = vmatprep.subr.bf16.mxu0 %v1066_v4  ;;  %v1073_v11 = vld [vmem:[#allocation3 + $0x90] sm:$0xff]   ;;  %v1074_v12 = vld [vmem:[#allocation3 + $0x58] sm:$0xff]   ;;  %v1078_v16 = vld [vmem:[#allocation3 + $0x60] sm:$0xff]  }
  0x17   :  { %964 = vmatprep.subr.bf16.mxu1 %v1067_v5  ;;  %v1075_v13 = vld [vmem:[#allocation3 + $0xd8] sm:$0xff]   ;;  %v1079_v17 = vld [vmem:[#allocation3 + $0xe0] sm:$0xff]   ;;  %v1082_v20 = vld [vmem:[#allocation3 + $0x68] sm:$0xff]  }
  0x18   :  { %v1076_v14 = vld [vmem:[#allocation3 + $0x18] sm:$0xff]   ;;  %v1080_v18 = vld [vmem:[#allocation3 + $0x20] sm:$0xff]   ;;  %v1083_v21 = vld [vmem:[#allocation3 + $0xe8] sm:$0xff]  }
  0x19   :  { %943 = vmatpush3.bf16.msra.mxu0 %v1068_v6  ;;  %v1077_v15 = vld [vmem:[#allocation3 + $0x98] sm:$0xff]   ;;  %v1081_v19 = vld [vmem:[#allocation3 + $0xa0] sm:$0xff]   ;;  %v1084_v22 = vld [vmem:[#allocation3 + $0x28] sm:$0xff]  }
  0x1a   :  { %965 = vmatpush3.bf16.msra.mxu1 %v1069_v7  ;;  %944 = vmatprep.subr.bf16.mxu0 %v1070_v8  ;;  %v1085_v23 = vld [vmem:[#allocation3 + $0xa8] sm:$0xff]   ;;  %v1086_v24 = vld [vmem:[#allocation3 + $0x70] sm:$0xff]   ;;  %v1090_v28 = vld [vmem:[#allocation3 + $0x78] sm:$0xff]  }
  0x1b   :  { %966 = vmatprep.subr.bf16.mxu1 %v1071_v9  ;;  %v1087_v25 = vld [vmem:[#allocation3 + $0xf0] sm:$0xff]   ;;  %v1091_v29 = vld [vmem:[#allocation3 + $0xf8] sm:$0xff]   ;;  %v36_v32 = vld [vmem:[%s1262_s0 + $0x8] sm:$0xff] }
  0x1c   :  { %v1088_v26 = vld [vmem:[#allocation3 + $0x30] sm:$0xff]   ;;  %v1092_v30 = vld [vmem:[#allocation3 + $0x38] sm:$0xff]   ;;  %v35_v34 = vld [vmem:[%s1262_s0] sm:$0xff]  ;;  %v44_v35 = vpack.c.bf16 %v36_v32, %v36_v32 }
  0x1d   :  { %945 = vmatpush3.bf16.msra.mxu0 %v1072_v10  ;;  %v1089_v27 = vld [vmem:[#allocation3 + $0xb0] sm:$0xff]   ;;  %v1093_v31 = vld [vmem:[#allocation3 + $0xb8] sm:$0xff]   ;;  %v43_v37 = vpack.c.bf16 %v35_v34, %v35_v34  ;;  %v1094_v40 = vld [vmem:[#allocation3 + $0x140] sm:$0xff]  }
  0x1e   :  { %967 = vmatpush3.bf16.msra.mxu1 %v1073_v11  ;;  %946 = vmatprep.subr.bf16.mxu0 %v1074_v12  ;;  %v38_v33 = vld [vmem:[%s1262_s0 + $0x18] sm:$0xff]  ;;  %v37_v38 = vld [vmem:[%s1262_s0 + $0x10] sm:$0xff]  ;;  %v1095_v41 = vld [vmem:[#allocation3 + $0x1c0] sm:$0xff]  }
  0x1f   :  { %968 = vmatprep.subr.bf16.mxu1 %v1075_v13  ;;  %v46_v36 = vpack.c.bf16 %v38_v33, %v38_v33  ;;  %v45_v39 = vpack.c.bf16 %v37_v38, %v37_v38  ;;  %595 = vmatprep.mubr.bf16.mxu0 %v44_v35  ;;  %v1096_v42 = vld [vmem:[#allocation3 + $0x100] sm:$0xff]   ;;  %v1098_v44 = vld [vmem:[#allocation3 + $0x148] sm:$0xff]   ;;  %v1102_v48 = vld [vmem:[#allocation3 + $0x150] sm:$0xff]  }
  0x20   :  { %v1097_v43 = vld [vmem:[#allocation3 + $0x180] sm:$0xff]   ;;  %v1099_v45 = vld [vmem:[#allocation3 + $0x1c8] sm:$0xff]   ;;  %v1103_v49 = vld [vmem:[#allocation3 + $0x1d0] sm:$0xff]  }
  0x21   :  { %947 = vmatpush3.bf16.msra.mxu0 %v1076_v14  ;;  %635 = vmatprep.mubr.bf16.mxu1 %v46_v36  ;;  %v1100_v46 = vld [vmem:[#allocation3 + $0x108] sm:$0xff]   ;;  %v1104_v50 = vld [vmem:[#allocation3 + $0x110] sm:$0xff]   ;;  %v1106_v52 = vld [vmem:[#allocation3 + $0x158] sm:$0xff]  }
  0x22   :  { %969 = vmatpush3.bf16.msra.mxu1 %v1077_v15  ;;  %948 = vmatprep.subr.bf16.mxu0 %v1078_v16  ;;  %v1101_v47 = vld [vmem:[#allocation3 + $0x188] sm:$0xff]   ;;  %v1105_v51 = vld [vmem:[#allocation3 + $0x190] sm:$0xff]   ;;  %v1107_v53 = vld [vmem:[#allocation3 + $0x1d8] sm:$0xff]  }
  0x23   :  { %970 = vmatprep.subr.bf16.mxu1 %v1079_v17  ;;  %v1108_v54 = vld [vmem:[#allocation3 + $0x118] sm:$0xff]   ;;  %v1110_v56 = vld [vmem:[#allocation3 + $0x160] sm:$0xff]   ;;  %v1114_v60 = vld [vmem:[#allocation3 + $0x168] sm:$0xff]   ;;  %v1161_v17 = vmov 0.0  }
  0x24   :  { %v1109_v55 = vld [vmem:[#allocation3 + $0x198] sm:$0xff]   ;;  %v1111_v57 = vld [vmem:[#allocation3 + $0x1e0] sm:$0xff]   ;;  %v1115_v61 = vld [vmem:[#allocation3 + $0x1e8] sm:$0xff]  }
  0x25   :  { %949 = vmatpush3.bf16.msra.mxu0 %v1080_v18  ;;  %v1112_v58 = vld [vmem:[#allocation3 + $0x120] sm:$0xff]   ;;  %v1116_v62 = vld [vmem:[#allocation3 + $0x128] sm:$0xff]   ;;  %v1118_v0 = vld [vmem:[#allocation3 + $0x170] sm:$0xff]  }
  0x26   :  { %971 = vmatpush3.bf16.msra.mxu1 %v1081_v19  ;;  %950 = vmatprep.subr.bf16.mxu0 %v1082_v20  ;;  %v1113_v59 = vld [vmem:[#allocation3 + $0x1a0] sm:$0xff]   ;;  %v1117_v63 = vld [vmem:[#allocation3 + $0x1a8] sm:$0xff]   ;;  %v1119_v1 = vld [vmem:[#allocation3 + $0x1f0] sm:$0xff]  }
  0x27   :  { %972 = vmatprep.subr.bf16.mxu1 %v1083_v21  ;;  %v1120_v2 = vld [vmem:[#allocation3 + $0x130] sm:$0xff]   ;;  %v1122_v4 = vld [vmem:[#allocation3 + $0x178] sm:$0xff]   ;;  %v40_v8 = vld [vmem:[%s1262_s0 + $0x28] sm:$0xff] }
  0x28   :  { %v1121_v3 = vld [vmem:[#allocation3 + $0x1b0] sm:$0xff]   ;;  %v1123_v5 = vld [vmem:[#allocation3 + $0x1f8] sm:$0xff]   ;;  %v48_v10 = vpack.c.bf16 %v40_v8, %v40_v8  ;;  %v39_v12 = vld [vmem:[%s1262_s0 + $0x20] sm:$0xff] }
  0x29   :  { %951 = vmatpush3.bf16.msra.mxu0 %v1084_v22  ;;  %v1124_v6 = vld [vmem:[#allocation3 + $0x138] sm:$0xff]   ;;  %v41_v13 = vld [vmem:[%s1262_s0 + $0x30] sm:$0xff]  ;;  %v47_v14 = vpack.c.bf16 %v39_v12, %v39_v12  ;;  %v1126_v16 = vld [vmem:[%s1265_s3] sm:$0xff]  }
  0x2a   :  { %973 = vmatpush3.bf16.msra.mxu1 %v1085_v23  ;;  %952 = vmatprep.subr.bf16.mxu0 %v1086_v24  ;;  %v1125_v7 = vld [vmem:[#allocation3 + $0x1b8] sm:$0xff]   ;;  %v49_v15 = vpack.c.bf16 %v41_v13, %v41_v13  ;;  %v1127_v18 = vld [vmem:[%s1265_s3 + $0x8] sm:$0xff]   ;;  %v1128_v19 = vld [vmem:[%s1265_s3 + $0x10] sm:$0xff]  }
  0x2b   :  { %974 = vmatprep.subr.bf16.mxu1 %v1087_v25  ;;  %v42_v9 = vld [vmem:[%s1262_s0 + $0x38] sm:$0xff]  ;;  %v1130_v21 = vld [vmem:[%s1265_s3 + $0x20] sm:$0xff]   ;;  %v1131_v22 = vld [vmem:[%s1265_s3 + $0x28] sm:$0xff]  }
  0x2c   :  { %v50_v11 = vpack.c.bf16 %v42_v9, %v42_v9  ;;  %v1129_v20 = vld [vmem:[%s1265_s3 + $0x18] sm:$0xff]   ;;  %v1132_v23 = vld [vmem:[%s1265_s3 + $0x30] sm:$0xff]  }
  0x2d   :  { %953 = vmatpush3.bf16.msra.mxu0 %v1088_v26  ;;  %v1133_v24 = vld [vmem:[%s1265_s3 + $0x38] sm:$0xff]  }
  0x2e   :  { %975 = vmatpush3.bf16.msra.mxu1 %v1089_v27  ;;  %954 = vmatprep.subr.bf16.mxu0 %v1090_v28 }
  0x2f   :  { %976 = vmatprep.subr.bf16.mxu1 %v1091_v29 }
  0x31   :  { %955 = vmatpush3.bf16.msra.mxu0 %v1092_v30 }
  0x32   :  { %977 = vmatpush3.bf16.msra.mxu1 %v1093_v31  ;;  %984 = vmatprep.subr.bf16.mxu0 %v1094_v40 }
  0x33   :  { %1006 = vmatprep.subr.bf16.mxu1 %v1095_v41 }
  0x34   :  { %596 = vmatmul.mubr.bf16.vlgmr.msra.gmra.mrb[0].mxu0 %v43_v37 }
  0x35   :  { %636 = vmatmul.mubr.bf16.vlgmr.msra.gmra.mrb[0].mxu1 %v45_v39  ;;  %985 = vmatpush3.bf16.msra.mxu0 %v1096_v42 }
  0x36   :  { %1007 = vmatpush3.bf16.msra.mxu1 %v1097_v43  ;;  %986 = vmatprep.subr.bf16.mxu0 %v1098_v44 }
  0x37   :  { %1008 = vmatprep.subr.bf16.mxu1 %v1099_v45  ;;  %675 = vmatprep.mubr.bf16.mxu0 %v48_v10 }
  0x38   :  { %715 = vmatprep.mubr.bf16.mxu1 %v50_v11 }
  0x39   :  { %987 = vmatpush3.bf16.msra.mxu0 %v1100_v46 }
  0x3a   :  { %1009 = vmatpush3.bf16.msra.mxu1 %v1101_v47  ;;  %988 = vmatprep.subr.bf16.mxu0 %v1102_v48  ;;  %v930_v47 = vld [vmem:[%s1264_s2] ss:$0 sm:$0xff] }
  0x3b   :  { %1010 = vmatprep.subr.bf16.mxu1 %v1103_v49 }
  0x3d   :  { %989 = vmatpush3.bf16.msra.mxu0 %v1104_v50 }
  0x3e   :  { %1011 = vmatpush3.bf16.msra.mxu1 %v1105_v51  ;;  %990 = vmatprep.subr.bf16.mxu0 %v1106_v52  ;;  %v931_v52 = vld [vmem:[%s1266_s4] ss:$0 sm:$0xff] }
  0x3f   :  { %1012 = vmatprep.subr.bf16.mxu1 %v1107_v53 }
  0x41   :  { %991 = vmatpush3.bf16.msra.mxu0 %v1108_v54 }
  0x42   :  { %1013 = vmatpush3.bf16.msra.mxu1 %v1109_v55  ;;  %992 = vmatprep.subr.bf16.mxu0 %v1110_v56 }
  0x43   :  { %1014 = vmatprep.subr.bf16.mxu1 %v1111_v57 }
  0x45   :  { %993 = vmatpush3.bf16.msra.mxu0 %v1112_v58 }
  0x46   :  { %1015 = vmatpush3.bf16.msra.mxu1 %v1113_v59  ;;  %994 = vmatprep.subr.bf16.mxu0 %v1114_v60 }
  0x47   :  { %1016 = vmatprep.subr.bf16.mxu1 %v1115_v61 }
  0x49   :  { %995 = vmatpush3.bf16.msra.mxu0 %v1116_v62 }
  0x4a   :  { %1017 = vmatpush3.bf16.msra.mxu1 %v1117_v63  ;;  %996 = vmatprep.subr.bf16.mxu0 %v1118_v0 }
  0x4b   :  { %1018 = vmatprep.subr.bf16.mxu1 %v1119_v1 }
  0x4d   :  { %997 = vmatpush3.bf16.msra.mxu0 %v1120_v2 }
  0x4e   :  { %1019 = vmatpush3.bf16.msra.mxu1 %v1121_v3  ;;  %998 = vmatprep.subr.bf16.mxu0 %v1122_v4 }
  0x4f   :  { %1020 = vmatprep.subr.bf16.mxu1 %v1123_v5 }
  0x51   :  { %999 = vmatpush3.bf16.msra.mxu0 %v1124_v6 }
  0x52   :  { %1021 = vmatpush3.bf16.msra.mxu1 %v1125_v7  ;;  %1037 = vmatprep.subr.bf16.mxu0 %v1161_v17 }
  0x54   :  { %676 = vmatmul.mubr.bf16.vlgmr.msra.gmra.mrb[4].mxu0 %v47_v14 }
  0x55   :  { %716 = vmatmul.mubr.bf16.vlgmr.msra.gmra.mrb[4].mxu1 %v49_v15  ;;  %1038 = vmatpush3.bf16.msra.mxu0 %v1126_v16 }
  0x56   :  { %1039 = vmatprep.subr.bf16.mxu0 %v1161_v17  ;;  %1053 = vmatprep.mubr.msk.bf16.mxu0 %vm1162_vm0, %v1161_v17 }
  0x59   :  { %1040 = vmatpush3.bf16.msra.mxu0 %v1127_v18 }
  0x5a   :  { %1041 = vmatprep.subr.bf16.mxu0 %v1161_v17 }
  0x5d   :  { %1042 = vmatpush3.bf16.msra.mxu0 %v1128_v19 }
  0x5e   :  { %1043 = vmatprep.subr.bf16.mxu0 %v1161_v17 }
  0x61   :  { %1044 = vmatpush3.bf16.msra.mxu0 %v1129_v20 }
  0x62   :  { %1045 = vmatprep.subr.bf16.mxu0 %v1161_v17 }
  0x65   :  { %1046 = vmatpush3.bf16.msra.mxu0 %v1130_v21 }
  0x66   :  { %1047 = vmatprep.subr.bf16.mxu0 %v1161_v17 }
  0x69   :  { %1048 = vmatpush3.bf16.msra.mxu0 %v1131_v22 }
  0x6a   :  { %1049 = vmatprep.subr.bf16.mxu0 %v1161_v17 }
  0x6d   :  { %1050 = vmatpush3.bf16.msra.mxu0 %v1132_v23 }
  0x6e   :  { %1051 = vmatprep.subr.bf16.mxu0 %v1161_v17 }
  0x71   :  { %1052 = vmatpush3.bf16.msra.mxu0 %v1133_v24 }
 0x107   :  { %v956_v25 = vpop.f32.mrb[0].mxu0 }
 0x108   :  { %v978_v26 = vpop.f32.mrb[0].mxu1  ;;  %v957_v27 = vpop.f32.mrb[1].mxu0 }
 0x109   :  { %v979_v28 = vpop.f32.mrb[1].mxu1  ;;  %v958_v29 = vadd.f32 %v957_v27, %v956_v25  ;;  %v959_v31 = vpop.f32.mrb[2].mxu0 }
 0x10a   :  { %v980_v30 = vadd.f32 %v979_v28, %v978_v26  ;;  %v981_v32 = vpop.f32.mrb[2].mxu1  ;;  %v960_v33 = vpop.f32.mrb[3].mxu0 }
 0x10b   :  { %v982_v34 = vpop.f32.mrb[3].mxu1 }
 0x10c   :  { %v638_v35 = vadd.f32 %v980_v30, %v958_v29 }
 0x127   :  { %v1000_v36 = vpop.f32.mrb[4].mxu0 }
 0x128   :  { %v1022_v37 = vpop.f32.mrb[4].mxu1  ;;  %v1001_v38 = vpop.f32.mrb[5].mxu0 }
 0x129   :  { %v1002_v39 = vadd.f32 %v1001_v38, %v1000_v36  ;;  %v1023_v40 = vpop.f32.mrb[5].mxu1  ;;  %v1003_v41 = vpop.f32.mrb[6].mxu0 }
 0x12a   :  { %v1024_v42 = vadd.f32 %v1023_v40, %v1022_v37  ;;  %v1025_v43 = vpop.f32.mrb[6].mxu1  ;;  %v1004_v44 = vpop.f32.mrb[7].mxu0 }
 0x12b   :  { %v678_v45 = vadd.f32 %v1002_v39, %v638_v35  ;;  %v1026_v46 = vpop.f32.mrb[7].mxu1 }
 0x12d   :  { %v718_v48 = vadd.f32 %v1024_v42, %v678_v45 }
 0x12f   :  { %v746_v49 = vadd.f32 %v930_v47, %v718_v48 }
 0x131   :  { %v747_v50 = vmax.f32 %v746_v49, 0.0 }
 0x133   :  { %v748_v51 = vpack.c.bf16 %v747_v50, %v747_v50 }
 0x135   :  { %1054 = vmatmul.mubr.bf16.vlgmr.msra.gmra.mrb[8].mxu0 %v748_v51 }
 0x208   :  { %v854_v53 = vpop.f32.mrb[8].mxu0 }
 0x209   :  { %v855_v54 = vadd.f32 %v931_v52, %v854_v53  ;;  %v1055_v55 = vpop.f32.mrb[9].mxu0 }
 0x20a   :  { %v857_v56 = vpop.f32.mrb[10].mxu0 }
 0x20b   :  { %860 = vst [vmem:[%s1267_s5] sm:$0xff] %v855_v54  ;;  %v1056_v57 = vpop.f32.mrb[11].mxu0 }
 0x20c   :  { %865 = vsyncpa [#allocation4], 1 }

// kernel: forward.1
= control target key start
LH: loop header
LB: loop body
LE: loop exit
PB: predicated region body
PF: predicated region fallthrough
CT: control target
= control target key end

     0   :  { %10 = vsyncpa [#allocation4], 0  ;;  %s1158_s18 = smov [#allocation3]   ;;  %s1262_s0 = inlined_call_operand.vmem [shape: f32[8,1024], index: 0, kind: input, shape index: {}]   ;;  %s1263_s1 = inlined_call_operand.hbm [shape: bf16[1024,128], index: 1, kind: input, shape index: {}]   ;;  %s1264_s2 = inlined_call_operand.vmem [shape: f32[1,128], index: 2, kind: input, shape index: {}]   ;;  %s1265_s3 = inlined_call_operand.vmem [shape: bf16[128,128], index: 3, kind: input, shape index: {}]   ;;  %s1266_s4 = inlined_call_operand.vmem [shape: f32[1,128], index: 4, kind: input, shape index: {}]   ;;  %s1267_s5 = inlined_call_operand.vmem [shape: f32[8,128], index: 5, kind: output, shape index: {}]  }
   0x1   :  { %s18_s19 = sshll.u32 %s1158_s18, 4  ;;  %s1134_s22 = scalar_lea.hbm %s1263_s1, 8192  ;;  %s19_s19 = int_to_ptr.vmem [resolvable:$true] %s18_s19 }
   0x2   :  { %p1135_p0 = scmp.ne.s32.totalorder %s1263_s1, %s1134_s22  ;;  %p1138_p1 = scmp.lt.u32.totalorder %s1134_s22, %s1263_s1 }
   0x4   :  { %p1140_p2 = pnand %p1138_p1, %p1135_p0 }
   0x6   :  { %1143 = shalt.err (!%p1140_p2)
}
   0x7   :  { %s1144_s27 = scalar_lea.vmem %s19_s19, 8192  ;;  %p1149_p4 = scmp.lt.s32.totalorder %s19_s19, %s19_s19 }
   0x8   :  { %p1145_p3 = scmp.ne.s32.totalorder %s19_s19, %s1144_s27  ;;  %p1150_p5 = scmp.lt.s32.totalorder %s1144_s27, %s1144_s27 }
   0xa   :  { %p1151_p6 = por %p1150_p5, %p1149_p4 }
   0xc   :  { %p1152_p7 = pnand %p1151_p6, %p1145_p3 }
   0xe   :  { %1155 = shalt.err (!%p1152_p7)
}
   0xf   :  { %s1159_s28 = smov 64   ;;  %s1160_s29 = smov 4  }
  0x10   :  { %24 = dma.hbm_to_vmem [thread:$0]  %s1263_s1, 8192, %s19_s19, [#allocation4], %s1159_s28, %s1159_s28, %s1160_s29  }
  0x11   :  { %1156 = dma.done.wait [#allocation4], 8192  }
  0x12   :  { %1157 = vsyncadd [#allocation4], 4294959104  ;;  %v1062_v0 = vld [vmem:[#allocation3 + $0x40] sm:$0xff]   ;;  %v1066_v4 = vld [vmem:[#allocation3 + $0x48] sm:$0xff]   ;;  %vm1162_vm0 = vmmov 0  }
  0x13   :  { %v1063_v1 = vld [vmem:[#allocation3 + $0xc0] sm:$0xff]   ;;  %940 = vmatprep.subr.bf16.mxu0 %v1062_v0  ;;  %v1067_v5 = vld [vmem:[#allocation3 + $0xc8] sm:$0xff]   ;;  %v1070_v8 = vld [vmem:[#allocation3 + $0x50] sm:$0xff]  }
  0x14   :  { %v1064_v2 = vld [vmem:[#allocation3] sm:$0xff]   ;;  %962 = vmatprep.subr.bf16.mxu1 %v1063_v1  ;;  %v1068_v6 = vld [vmem:[#allocation3 + $0x8] sm:$0xff]   ;;  %v1071_v9 = vld [vmem:[#allocation3 + $0xd0] sm:$0xff]  }
  0x15   :  { %v1065_v3 = vld [vmem:[#allocation3 + $0x80] sm:$0xff]   ;;  %941 = vmatpush3.bf16.msra.mxu0 %v1064_v2  ;;  %v1069_v7 = vld [vmem:[#allocation3 + $0x88] sm:$0xff]   ;;  %v1072_v10 = vld [vmem:[#allocation3 + $0x10] sm:$0xff]  }
  0x16   :  { %963 = vmatpush3.bf16.msra.mxu1 %v1065_v3  ;;  %942 = vmatprep.subr.bf16.mxu0 %v1066_v4  ;;  %v1073_v11 = vld [vmem:[#allocation3 + $0x90] sm:$0xff]   ;;  %v1074_v12 = vld [vmem:[#allocation3 + $0x58] sm:$0xff]   ;;  %v1078_v16 = vld [vmem:[#allocation3 + $0x60] sm:$0xff]  }
  0x17   :  { %964 = vmatprep.subr.bf16.mxu1 %v1067_v5  ;;  %v1075_v13 = vld [vmem:[#allocation3 + $0xd8] sm:$0xff]   ;;  %v1079_v17 = vld [vmem:[#allocation3 + $0xe0] sm:$0xff]   ;;  %v1082_v20 = vld [vmem:[#allocation3 + $0x68] sm:$0xff]  }
  0x18   :  { %v1076_v14 = vld [vmem:[#allocation3 + $0x18] sm:$0xff]   ;;  %v1080_v18 = vld [vmem:[#allocation3 + $0x20] sm:$0xff]   ;;  %v1083_v21 = vld [vmem:[#allocation3 + $0xe8] sm:$0xff]  }
  0x19   :  { %943 = vmatpush3.bf16.msra.mxu0 %v1068_v6  ;;  %v1077_v15 = vld [vmem:[#allocation3 + $0x98] sm:$0xff]   ;;  %v1081_v19 = vld [vmem:[#allocation3 + $0xa0] sm:$0xff]   ;;  %v1084_v22 = vld [vmem:[#allocation3 + $0x28] sm:$0xff]  }
  0x1a   :  { %965 = vmatpush3.bf16.msra.mxu1 %v1069_v7  ;;  %944 = vmatprep.subr.bf16.mxu0 %v1070_v8  ;;  %v1085_v23 = vld [vmem:[#allocation3 + $0xa8] sm:$0xff]   ;;  %v1086_v24 = vld [vmem:[#allocation3 + $0x70] sm:$0xff]   ;;  %v1090_v28 = vld [vmem:[#allocation3 + $0x78] sm:$0xff]  }
  0x1b   :  { %966 = vmatprep.subr.bf16.mxu1 %v1071_v9  ;;  %v1087_v25 = vld [vmem:[#allocation3 + $0xf0] sm:$0xff]   ;;  %v1091_v29 = vld [vmem:[#allocation3 + $0xf8] sm:$0xff]   ;;  %v36_v32 = vld [vmem:[%s1262_s0 + $0x8] sm:$0xff] }
  0x1c   :  { %v1088_v26 = vld [vmem:[#allocation3 + $0x30] sm:$0xff]   ;;  %v1092_v30 = vld [vmem:[#allocation3 + $0x38] sm:$0xff]   ;;  %v35_v34 = vld [vmem:[%s1262_s0] sm:$0xff]  ;;  %v44_v35 = vpack.c.bf16 %v36_v32, %v36_v32 }
  0x1d   :  { %945 = vmatpush3.bf16.msra.mxu0 %v1072_v10  ;;  %v1089_v27 = vld [vmem:[#allocation3 + $0xb0] sm:$0xff]   ;;  %v1093_v31 = vld [vmem:[#allocation3 + $0xb8] sm:$0xff]   ;;  %v43_v37 = vpack.c.bf16 %v35_v34, %v35_v34  ;;  %v1094_v40 = vld [vmem:[#allocation3 + $0x140] sm:$0xff]  }
  0x1e   :  { %967 = vmatpush3.bf16.msra.mxu1 %v1073_v11  ;;  %946 = vmatprep.subr.bf16.mxu0 %v1074_v12  ;;  %v38_v33 = vld [vmem:[%s1262_s0 + $0x18] sm:$0xff]  ;;  %v37_v38 = vld [vmem:[%s1262_s0 + $0x10] sm:$0xff]  ;;  %v1095_v41 = vld [vmem:[#allocation3 + $0x1c0] sm:$0xff]  }
  0x1f   :  { %968 = vmatprep.subr.bf16.mxu1 %v1075_v13  ;;  %v46_v36 = vpack.c.bf16 %v38_v33, %v38_v33  ;;  %v45_v39 = vpack.c.bf16 %v37_v38, %v37_v38  ;;  %595 = vmatprep.mubr.bf16.mxu0 %v44_v35  ;;  %v1096_v42 = vld [vmem:[#allocation3 + $0x100] sm:$0xff]   ;;  %v1098_v44 = vld [vmem:[#allocation3 + $0x148] sm:$0xff]   ;;  %v1102_v48 = vld [vmem:[#allocation3 + $0x150] sm:$0xff]  }
  0x20   :  { %v1097_v43 = vld [vmem:[#allocation3 + $0x180] sm:$0xff]   ;;  %v1099_v45 = vld [vmem:[#allocation3 + $0x1c8] sm:$0xff]   ;;  %v1103_v49 = vld [vmem:[#allocation3 + $0x1d0] sm:$0xff]  }
  0x21   :  { %947 = vmatpush3.bf16.msra.mxu0 %v1076_v14  ;;  %635 = vmatprep.mubr.bf16.mxu1 %v46_v36  ;;  %v1100_v46 = vld [vmem:[#allocation3 + $0x108] sm:$0xff]   ;;  %v1104_v50 = vld [vmem:[#allocation3 + $0x110] sm:$0xff]   ;;  %v1106_v52 = vld [vmem:[#allocation3 + $0x158] sm:$0xff]  }
  0x22   :  { %969 = vmatpush3.bf16.msra.mxu1 %v1077_v15  ;;  %948 = vmatprep.subr.bf16.mxu0 %v1078_v16  ;;  %v1101_v47 = vld [vmem:[#allocation3 + $0x188] sm:$0xff]   ;;  %v1105_v51 = vld [vmem:[#allocation3 + $0x190] sm:$0xff]   ;;  %v1107_v53 = vld [vmem:[#allocation3 + $0x1d8] sm:$0xff]  }
  0x23   :  { %970 = vmatprep.subr.bf16.mxu1 %v1079_v17  ;;  %v1108_v54 = vld [vmem:[#allocation3 + $0x118] sm:$0xff]   ;;  %v1110_v56 = vld [vmem:[#allocation3 + $0x160] sm:$0xff]   ;;  %v1114_v60 = vld [vmem:[#allocation3 + $0x168] sm:$0xff]   ;;  %v1161_v17 = vmov 0.0  }
  0x24   :  { %v1109_v55 = vld [vmem:[#allocation3 + $0x198] sm:$0xff]   ;;  %v1111_v57 = vld [vmem:[#allocation3 + $0x1e0] sm:$0xff]   ;;  %v1115_v61 = vld [vmem:[#allocation3 + $0x1e8] sm:$0xff]  }
  0x25   :  { %949 = vmatpush3.bf16.msra.mxu0 %v1080_v18  ;;  %v1112_v58 = vld [vmem:[#allocation3 + $0x120] sm:$0xff]   ;;  %v1116_v62 = vld [vmem:[#allocation3 + $0x128] sm:$0xff]   ;;  %v1118_v0 = vld [vmem:[#allocation3 + $0x170] sm:$0xff]  }
  0x26   :  { %971 = vmatpush3.bf16.msra.mxu1 %v1081_v19  ;;  %950 = vmatprep.subr.bf16.mxu0 %v1082_v20  ;;  %v1113_v59 = vld [vmem:[#allocation3 + $0x1a0] sm:$0xff]   ;;  %v1117_v63 = vld [vmem:[#allocation3 + $0x1a8] sm:$0xff]   ;;  %v1119_v1 = vld [vmem:[#allocation3 + $0x1f0] sm:$0xff]  }
  0x27   :  { %972 = vmatprep.subr.bf16.mxu1 %v1083_v21  ;;  %v1120_v2 = vld [vmem:[#allocation3 + $0x130] sm:$0xff]   ;;  %v1122_v4 = vld [vmem:[#allocation3 + $0x178] sm:$0xff]   ;;  %v40_v8 = vld [vmem:[%s1262_s0 + $0x28] sm:$0xff] }
  0x28   :  { %v1121_v3 = vld [vmem:[#allocation3 + $0x1b0] sm:$0xff]   ;;  %v1123_v5 = vld [vmem:[#allocation3 + $0x1f8] sm:$0xff]   ;;  %v48_v10 = vpack.c.bf16 %v40_v8, %v40_v8  ;;  %v39_v12 = vld [vmem:[%s1262_s0 + $0x20] sm:$0xff] }
  0x29   :  { %951 = vmatpush3.bf16.msra.mxu0 %v1084_v22  ;;  %v1124_v6 = vld [vmem:[#allocation3 + $0x138] sm:$0xff]   ;;  %v41_v13 = vld [vmem:[%s1262_s0 + $0x30] sm:$0xff]  ;;  %v47_v14 = vpack.c.bf16 %v39_v12, %v39_v12  ;;  %v1126_v16 = vld [vmem:[%s1265_s3] sm:$0xff]  }
  0x2a   :  { %973 = vmatpush3.bf16.msra.mxu1 %v1085_v23  ;;  %952 = vmatprep.subr.bf16.mxu0 %v1086_v24  ;;  %v1125_v7 = vld [vmem:[#allocation3 + $0x1b8] sm:$0xff]   ;;  %v49_v15 = vpack.c.bf16 %v41_v13, %v41_v13  ;;  %v1127_v18 = vld [vmem:[%s1265_s3 + $0x8] sm:$0xff]   ;;  %v1128_v19 = vld [vmem:[%s1265_s3 + $0x10] sm:$0xff]  }
  0x2b   :  { %974 = vmatprep.subr.bf16.mxu1 %v1087_v25  ;;  %v42_v9 = vld [vmem:[%s1262_s0 + $0x38] sm:$0xff]  ;;  %v1130_v21 = vld [vmem:[%s1265_s3 + $0x20] sm:$0xff]   ;;  %v1131_v22 = vld [vmem:[%s1265_s3 + $0x28] sm:$0xff]  }
  0x2c   :  { %v50_v11 = vpack.c.bf16 %v42_v9, %v42_v9  ;;  %v1129_v20 = vld [vmem:[%s1265_s3 + $0x18] sm:$0xff]   ;;  %v1132_v23 = vld [vmem:[%s1265_s3 + $0x30] sm:$0xff]  }
  0x2d   :  { %953 = vmatpush3.bf16.msra.mxu0 %v1088_v26  ;;  %v1133_v24 = vld [vmem:[%s1265_s3 + $0x38] sm:$0xff]  }
  0x2e   :  { %975 = vmatpush3.bf16.msra.mxu1 %v1089_v27  ;;  %954 = vmatprep.subr.bf16.mxu0 %v1090_v28 }
  0x2f   :  { %976 = vmatprep.subr.bf16.mxu1 %v1091_v29 }
  0x31   :  { %955 = vmatpush3.bf16.msra.mxu0 %v1092_v30 }
  0x32   :  { %977 = vmatpush3.bf16.msra.mxu1 %v1093_v31  ;;  %984 = vmatprep.subr.bf16.mxu0 %v1094_v40 }
  0x33   :  { %1006 = vmatprep.subr.bf16.mxu1 %v1095_v41 }
  0x34   :  { %596 = vmatmul.mubr.bf16.vlgmr.msra.gmra.mrb[0].mxu0 %v43_v37 }
  0x35   :  { %636 = vmatmul.mubr.bf16.vlgmr.msra.gmra.mrb[0].mxu1 %v45_v39  ;;  %985 = vmatpush3.bf16.msra.mxu0 %v1096_v42 }
  0x36   :  { %1007 = vmatpush3.bf16.msra.mxu1 %v1097_v43  ;;  %986 = vmatprep.subr.bf16.mxu0 %v1098_v44 }
  0x37   :  { %1008 = vmatprep.subr.bf16.mxu1 %v1099_v45  ;;  %675 = vmatprep.mubr.bf16.mxu0 %v48_v10 }
  0x38   :  { %715 = vmatprep.mubr.bf16.mxu1 %v50_v11 }
  0x39   :  { %987 = vmatpush3.bf16.msra.mxu0 %v1100_v46 }
  0x3a   :  { %1009 = vmatpush3.bf16.msra.mxu1 %v1101_v47  ;;  %988 = vmatprep.subr.bf16.mxu0 %v1102_v48  ;;  %v930_v47 = vld [vmem:[%s1264_s2] ss:$0 sm:$0xff] }
  0x3b   :  { %1010 = vmatprep.subr.bf16.mxu1 %v1103_v49 }
  0x3d   :  { %989 = vmatpush3.bf16.msra.mxu0 %v1104_v50 }
  0x3e   :  { %1011 = vmatpush3.bf16.msra.mxu1 %v1105_v51  ;;  %990 = vmatprep.subr.bf16.mxu0 %v1106_v52  ;;  %v931_v52 = vld [vmem:[%s1266_s4] ss:$0 sm:$0xff] }
  0x3f   :  { %1012 = vmatprep.subr.bf16.mxu1 %v1107_v53 }
  0x41   :  { %991 = vmatpush3.bf16.msra.mxu0 %v1108_v54 }
  0x42   :  { %1013 = vmatpush3.bf16.msra.mxu1 %v1109_v55  ;;  %992 = vmatprep.subr.bf16.mxu0 %v1110_v56 }
  0x43   :  { %1014 = vmatprep.subr.bf16.mxu1 %v1111_v57 }
  0x45   :  { %993 = vmatpush3.bf16.msra.mxu0 %v1112_v58 }
  0x46   :  { %1015 = vmatpush3.bf16.msra.mxu1 %v1113_v59  ;;  %994 = vmatprep.subr.bf16.mxu0 %v1114_v60 }
  0x47   :  { %1016 = vmatprep.subr.bf16.mxu1 %v1115_v61 }
  0x49   :  { %995 = vmatpush3.bf16.msra.mxu0 %v1116_v62 }
  0x4a   :  { %1017 = vmatpush3.bf16.msra.mxu1 %v1117_v63  ;;  %996 = vmatprep.subr.bf16.mxu0 %v1118_v0 }
  0x4b   :  { %1018 = vmatprep.subr.bf16.mxu1 %v1119_v1 }
  0x4d   :  { %997 = vmatpush3.bf16.msra.mxu0 %v1120_v2 }
  0x4e   :  { %1019 = vmatpush3.bf16.msra.mxu1 %v1121_v3  ;;  %998 = vmatprep.subr.bf16.mxu0 %v1122_v4 }
  0x4f   :  { %1020 = vmatprep.subr.bf16.mxu1 %v1123_v5 }
  0x51   :  { %999 = vmatpush3.bf16.msra.mxu0 %v1124_v6 }
  0x52   :  { %1021 = vmatpush3.bf16.msra.mxu1 %v1125_v7  ;;  %1037 = vmatprep.subr.bf16.mxu0 %v1161_v17 }
  0x54   :  { %676 = vmatmul.mubr.bf16.vlgmr.msra.gmra.mrb[4].mxu0 %v47_v14 }
  0x55   :  { %716 = vmatmul.mubr.bf16.vlgmr.msra.gmra.mrb[4].mxu1 %v49_v15  ;;  %1038 = vmatpush3.bf16.msra.mxu0 %v1126_v16 }
  0x56   :  { %1039 = vmatprep.subr.bf16.mxu0 %v1161_v17  ;;  %1053 = vmatprep.mubr.msk.bf16.mxu0 %vm1162_vm0, %v1161_v17 }
  0x59   :  { %1040 = vmatpush3.bf16.msra.mxu0 %v1127_v18 }
  0x5a   :  { %1041 = vmatprep.subr.bf16.mxu0 %v1161_v17 }
  0x5d   :  { %1042 = vmatpush3.bf16.msra.mxu0 %v1128_v19 }
  0x5e   :  { %1043 = vmatprep.subr.bf16.mxu0 %v1161_v17 }
  0x61   :  { %1044 = vmatpush3.bf16.msra.mxu0 %v1129_v20 }
  0x62   :  { %1045 = vmatprep.subr.bf16.mxu0 %v1161_v17 }
  0x65   :  { %1046 = vmatpush3.bf16.msra.mxu0 %v1130_v21 }
  0x66   :  { %1047 = vmatprep.subr.bf16.mxu0 %v1161_v17 }
  0x69   :  { %1048 = vmatpush3.bf16.msra.mxu0 %v1131_v22 }
  0x6a   :  { %1049 = vmatprep.subr.bf16.mxu0 %v1161_v17 }
  0x6d   :  { %1050 = vmatpush3.bf16.msra.mxu0 %v1132_v23 }
  0x6e   :  { %1051 = vmatprep.subr.bf16.mxu0 %v1161_v17 }
  0x71   :  { %1052 = vmatpush3.bf16.msra.mxu0 %v1133_v24 }
 0x107   :  { %v956_v25 = vpop.f32.mrb[0].mxu0 }
 0x108   :  { %v978_v26 = vpop.f32.mrb[0].mxu1  ;;  %v957_v27 = vpop.f32.mrb[1].mxu0 }
 0x109   :  { %v979_v28 = vpop.f32.mrb[1].mxu1  ;;  %v958_v29 = vadd.f32 %v957_v27, %v956_v25  ;;  %v959_v31 = vpop.f32.mrb[2].mxu0 }
 0x10a   :  { %v980_v30 = vadd.f32 %v979_v28, %v978_v26  ;;  %v981_v32 = vpop.f32.mrb[2].mxu1  ;;  %v960_v33 = vpop.f32.mrb[3].mxu0 }
 0x10b   :  { %v982_v34 = vpop.f32.mrb[3].mxu1 }
 0x10c   :  { %v638_v35 = vadd.f32 %v980_v30, %v958_v29 }
 0x127   :  { %v1000_v36 = vpop.f32.mrb[4].mxu0 }
 0x128   :  { %v1022_v37 = vpop.f32.mrb[4].mxu1  ;;  %v1001_v38 = vpop.f32.mrb[5].mxu0 }
 0x129   :  { %v1002_v39 = vadd.f32 %v1001_v38, %v1000_v36  ;;  %v1023_v40 = vpop.f32.mrb[5].mxu1  ;;  %v1003_v41 = vpop.f32.mrb[6].mxu0 }
 0x12a   :  { %v1024_v42 = vadd.f32 %v1023_v40, %v1022_v37  ;;  %v1025_v43 = vpop.f32.mrb[6].mxu1  ;;  %v1004_v44 = vpop.f32.mrb[7].mxu0 }
 0x12b   :  { %v678_v45 = vadd.f32 %v1002_v39, %v638_v35  ;;  %v1026_v46 = vpop.f32.mrb[7].mxu1 }
 0x12d   :  { %v718_v48 = vadd.f32 %v1024_v42, %v678_v45 }
 0x12f   :  { %v746_v49 = vadd.f32 %v930_v47, %v718_v48 }
 0x131   :  { %v747_v50 = vmax.f32 %v746_v49, 0.0 }
 0x133   :  { %v748_v51 = vpack.c.bf16 %v747_v50, %v747_v50 }
 0x135   :  { %1054 = vmatmul.mubr.bf16.vlgmr.msra.gmra.mrb[8].mxu0 %v748_v51 }
 0x208   :  { %v854_v53 = vpop.f32.mrb[8].mxu0 }
 0x209   :  { %v855_v54 = vadd.f32 %v931_v52, %v854_v53  ;;  %v1055_v55 = vpop.f32.mrb[9].mxu0 }
 0x20a   :  { %v857_v56 = vpop.f32.mrb[10].mxu0 }
 0x20b   :  { %860 = vst [vmem:[%s1267_s5] sm:$0xff] %v855_v54  ;;  %v1056_v57 = vpop.f32.mrb[11].mxu0 }
 0x20c   :  { %865 = vsyncpa [#allocation4], 1 }

</bundles_post_ra>
